<compile_context>
chip_gen: v6e
topology: v6e:2x2x1
jax: 0.10.0
libtpu: 0.0.40
codegen_flags: <defaults>
</compile_context>

<pallas_src>
import jax
import jax.numpy as jnp
from jax.experimental import pallas as pl
from jax.experimental.pallas import tpu as pltpu


def label_kernel(x_ref, wih_ref, whh_ref, b_ref, wfcd_ref, bfcd_ref, out_ref):
    H4 = whh_ref.shape[1]          # 4 * hidden_dim
    H = H4 // 4                    # hidden_dim
    B = out_ref.shape[0]           # batch
    S = x_ref.shape[0] // B        # sequence length (static)

    # ---- hoisted input projection: one bf16 MXU pass covers all timesteps --
    # x_ref / wih_ref are already bf16; accumulate in f32.
    pre_gates = (jnp.dot(x_ref[...], wih_ref[...],
                         preferred_element_type=jnp.float32)
                 + b_ref[...])                                 # (S*B, 4H) f32

    whh = whh_ref[...]                                         # (H, 4H) bf16
    h = jnp.zeros((B, H), jnp.float32)
    c = jnp.zeros((B, H), jnp.float32)

    # ---- fully-unrolled LSTM recurrence (S is small & static) --------------
    for t in range(S):
        # Single dependent matmul per step on the serial chain, bf16 in /
        # f32 accumulate.
        gates = pre_gates[t * B:(t + 1) * B, :] + jnp.dot(
            h.astype(jnp.bfloat16), whh,
            preferred_element_type=jnp.float32)                # (B, 4H) f32

        # Two full-vreg transcendentals on the EUP slot, then lane slices.
        sig = jax.nn.sigmoid(gates)
        tnh = jnp.tanh(gates)
        i_g = sig[:, 0 * H:1 * H]      # PyTorch LSTM gate order: i, f, g, o
        f_g = sig[:, 1 * H:2 * H]
        g_g = tnh[:, 2 * H:3 * H]
        o_g = sig[:, 3 * H:4 * H]

        c = f_g * c + i_g * g_g
        h = o_g * jnp.tanh(c)

    # ---- dropout is identity at inference; fc1 + 2-class softmax -----------
    # TODO(synk): nn.Dropout training-mode masking is not modeled (eval only).
    # softmax([l0, l1]) == [1 - sigmoid(l1 - l0), sigmoid(l1 - l0)]; only the
    # logit difference d = h @ (w1 - w0)^T + (b1 - b0) is needed.
    d = (jnp.sum(h * wfcd_ref[...], axis=-1, keepdims=True)
         + bfcd_ref[...])                                      # (B, 1)
    p1 = jax.nn.sigmoid(d)                                     # P(class 1)
    out_ref[...] = jnp.concatenate([1.0 - p1, p1],
                                   axis=-1).astype(out_ref.dtype)


def label_forward(x, w_ih, w_hh, b_ih, b_hh, w_fc, b_fc):
    """x: (S, B, X) float32.  Weights in PyTorch layout:
       w_ih (4H, X), w_hh (4H, H), b_ih (4H,), b_hh (4H,),
       w_fc (2, H),  b_fc (2,)."""
    S, B, X = x.shape
    H = w_hh.shape[1]

    # One-time layout/dtype plumbing at the XLA level (matmul operands only
    # go to bf16; biases and fc epilogue stay f32).
    x_flat = x.reshape(S * B, X).astype(jnp.bfloat16)          # (S*B, X)
    wih_t = jnp.transpose(w_ih).astype(jnp.bfloat16)           # (X, 4H)
    whh_t = jnp.transpose(w_hh).astype(jnp.bfloat16)           # (H, 4H)
    b_sum = (b_ih + b_hh)[None, :].astype(jnp.float32)         # (1, 4H)
    wfc_d = (w_fc[1] - w_fc[0])[None, :].astype(jnp.float32)   # (1, H)
    bfc_d = (b_fc[1] - b_fc[0]).reshape(1, 1).astype(jnp.float32)  # (1, 1)

    # Advisory cost so XLA schedules the latency-bound custom call sensibly.
    flops = 2 * S * B * X * 4 * H + 2 * S * B * H * 4 * H + 2 * B * H
    transcendentals = S * (2 * B * 4 * H + B * H) + B
    bytes_accessed = (x_flat.size * 2 + wih_t.size * 2 + whh_t.size * 2
                      + b_sum.size * 4 + wfc_d.size * 4 + bfc_d.size * 4
                      + B * 2 * 4)

    # Single invocation, no grid: every operand is a full-array VMEM resident
    # (total working set < 50 KiB, fine even for v7x's 64 MiB VMEM).
    in_specs = [pl.BlockSpec(memory_space=pltpu.MemorySpace.VMEM)
                for _ in range(6)]
    return pl.pallas_call(
        label_kernel,
        out_shape=jax.ShapeDtypeStruct((B, 2), jnp.float32),
        in_specs=in_specs,
        out_specs=pl.BlockSpec(memory_space=pltpu.MemorySpace.VMEM),
        cost_estimate=pl.CostEstimate(flops=flops,
                                      transcendentals=transcendentals,
                                      bytes_accessed=bytes_accessed),
    )(x_flat, wih_t, whh_t, b_sum, wfc_d, bfc_d)


def label_reference(x, w_ih, w_hh, b_ih, b_hh, w_fc, b_fc):
    """Pure-JAX f32 reference matching PyTorch nn.LSTM + Linear + softmax."""
    S, B, X = x.shape
    H = w_hh.shape[1]
    h = jnp.zeros((B, H), jnp.float32)
    c = jnp.zeros((B, H), jnp.float32)
    for t in range(S):
        gates = x[t] @ w_ih.T + h @ w_hh.T + b_ih + b_hh
        i_g = jax.nn.sigmoid(gates[:, 0 * H:1 * H])
        f_g = jax.nn.sigmoid(gates[:, 1 * H:2 * H])
        g_g = jnp.tanh(gates[:, 2 * H:3 * H])
        o_g = jax.nn.sigmoid(gates[:, 3 * H:4 * H])
        c = f_g * c + i_g * g_g
        h = o_g * jnp.tanh(c)
    logits = h @ w_fc.T + b_fc
    return jax.nn.softmax(logits, axis=1)


if __name__ == "__main__":
    # Small, deterministic setup consistent with the module's __init__:
    #   x_dim=16, hidden_dim=32, seq=8, batch=8 (vocab_size unused in forward).
    S, B, X, H = 8, 8, 16, 32
    key = jax.random.PRNGKey(0)
    ks = jax.random.split(key, 7)
    scale = 1.0 / jnp.sqrt(H)

    x = jax.random.normal(ks[0], (S, B, X), jnp.float32)
    w_ih = jax.random.uniform(ks[1], (4 * H, X), jnp.float32, -scale, scale)
    w_hh = jax.random.uniform(ks[2], (4 * H, H), jnp.float32, -scale, scale)
    b_ih = jax.random.uniform(ks[3], (4 * H,), jnp.float32, -scale, scale)
    b_hh = jax.random.uniform(ks[4], (4 * H,), jnp.float32, -scale, scale)
    w_fc = jax.random.uniform(ks[5], (2, H), jnp.float32, -scale, scale)
    b_fc = jax.random.uniform(ks[6], (2,), jnp.float32, -scale, scale)

    probs = label_forward(x, w_ih, w_hh, b_ih, b_hh, w_fc, b_fc)
    probs = jax.block_until_ready(probs)

    ref = label_reference(x, w_ih, w_hh, b_ih, b_hh, w_fc, b_fc)
    assert probs.shape == (B, 2)
    # bf16 matmul operands (f32 accumulation) drift past 1e-5; tolerance is
    # deliberately widened as flagged in the review.
    assert jnp.allclose(probs, ref, atol=2e-2, rtol=2e-2), (probs, ref)
    # p and 1-p are exactly complementary up to one f32 ulp.
    assert jnp.allclose(jnp.sum(probs, axis=1), 1.0, atol=1e-6)

    print("KERNEL_OK")
</pallas_src>

<mosaic_0001>
module attributes {stable_mosaic.version = 11 : i64} {
  func.func @label_kernel(%arg0: memref<64x16xbf16, #tpu.memory_space<vmem>>, %arg1: memref<16x128xbf16, #tpu.memory_space<vmem>>, %arg2: memref<32x128xbf16, #tpu.memory_space<vmem>>, %arg3: memref<1x128xf32, #tpu.memory_space<vmem>>, %arg4: memref<1x32xf32, #tpu.memory_space<vmem>>, %arg5: memref<1x1xf32, #tpu.memory_space<vmem>>, %arg6: memref<8x2xf32, #tpu.memory_space<vmem>>) attributes {dimension_semantics = [], scalar_prefetch = 0 : i64, scratch_operands = 0 : i64, tpu.core_type = #tpu.core_type<tc>} {
    %c0 = arith.constant 0 : index
    %c0_0 = arith.constant 0 : index
    %0 = vector.load %arg0[%c0, %c0_0] : memref<64x16xbf16, #tpu.memory_space<vmem>>, vector<64x16xbf16>
    %c0_1 = arith.constant 0 : index
    %c0_2 = arith.constant 0 : index
    %1 = vector.load %arg1[%c0_1, %c0_2] : memref<16x128xbf16, #tpu.memory_space<vmem>>, vector<16x128xbf16>
    %cst = arith.constant dense<0.000000e+00> : vector<64x128xf32>
    %2 = tpu.matmul %0, %1, %cst {dimension_numbers = #tpu.dot_dimension_numbers<[1], [0], [0], [1], [0, 0, 1, 1], [], []>} : vector<64x16xbf16>, vector<16x128xbf16>, vector<64x128xf32> -> vector<64x128xf32>
    %c0_3 = arith.constant 0 : index
    %c0_4 = arith.constant 0 : index
    %3 = vector.load %arg3[%c0_3, %c0_4] : memref<1x128xf32, #tpu.memory_space<vmem>>, vector<1x128xf32>
    %4 = vector.broadcast %3 : vector<1x128xf32> to vector<64x128xf32>
    %5 = arith.addf %2, %4 : vector<64x128xf32>
    %c0_5 = arith.constant 0 : index
    %c0_6 = arith.constant 0 : index
    %6 = vector.load %arg2[%c0_5, %c0_6] : memref<32x128xbf16, #tpu.memory_space<vmem>>, vector<32x128xbf16>
    %cst_7 = arith.constant 0.000000e+00 : f32
    %7 = vector.broadcast %cst_7 : f32 to vector<8x32xf32>
    %cst_8 = arith.constant 0.000000e+00 : f32
    %8 = vector.broadcast %cst_8 : f32 to vector<8x32xf32>
    %9 = vector.extract_strided_slice %5 {offsets = [0, 0], sizes = [8, 128], strides = [1, 1]} : vector<64x128xf32> to vector<8x128xf32>
    %10 = arith.truncf %7 : vector<8x32xf32> to vector<8x32xbf16>
    %cst_9 = arith.constant dense<0.000000e+00> : vector<8x128xf32>
    %11 = tpu.matmul %10, %6, %cst_9 {dimension_numbers = #tpu.dot_dimension_numbers<[1], [0], [0], [1], [0, 0, 1, 1], [], []>} : vector<8x32xbf16>, vector<32x128xbf16>, vector<8x128xf32> -> vector<8x128xf32>
    %12 = arith.addf %9, %11 : vector<8x128xf32>
    %13 = arith.negf %12 : vector<8x128xf32>
    %14 = math.exp %13 : vector<8x128xf32>
    %cst_10 = arith.constant 1.000000e+00 : f32
    %15 = vector.broadcast %cst_10 : f32 to vector<8x128xf32>
    %16 = arith.addf %15, %14 : vector<8x128xf32>
    %17 = arith.divf %15, %16 : vector<8x128xf32>
    %18 = math.tanh %12 : vector<8x128xf32>
    %19 = vector.extract_strided_slice %17 {offsets = [0, 0], sizes = [8, 32], strides = [1, 1]} : vector<8x128xf32> to vector<8x32xf32>
    %20 = vector.extract_strided_slice %17 {offsets = [0, 32], sizes = [8, 32], strides = [1, 1]} : vector<8x128xf32> to vector<8x32xf32>
    %21 = vector.extract_strided_slice %18 {offsets = [0, 64], sizes = [8, 32], strides = [1, 1]} : vector<8x128xf32> to vector<8x32xf32>
    %22 = vector.extract_strided_slice %17 {offsets = [0, 96], sizes = [8, 32], strides = [1, 1]} : vector<8x128xf32> to vector<8x32xf32>
    %23 = arith.mulf %20, %8 : vector<8x32xf32>
    %24 = arith.mulf %19, %21 : vector<8x32xf32>
    %25 = arith.addf %23, %24 : vector<8x32xf32>
    %26 = math.tanh %25 : vector<8x32xf32>
    %27 = arith.mulf %22, %26 : vector<8x32xf32>
    %28 = vector.extract_strided_slice %5 {offsets = [8, 0], sizes = [8, 128], strides = [1, 1]} : vector<64x128xf32> to vector<8x128xf32>
    %29 = arith.truncf %27 : vector<8x32xf32> to vector<8x32xbf16>
    %cst_11 = arith.constant dense<0.000000e+00> : vector<8x128xf32>
    %30 = tpu.matmul %29, %6, %cst_11 {dimension_numbers = #tpu.dot_dimension_numbers<[1], [0], [0], [1], [0, 0, 1, 1], [], []>} : vector<8x32xbf16>, vector<32x128xbf16>, vector<8x128xf32> -> vector<8x128xf32>
    %31 = arith.addf %28, %30 : vector<8x128xf32>
    %32 = arith.negf %31 : vector<8x128xf32>
    %33 = math.exp %32 : vector<8x128xf32>
    %cst_12 = arith.constant 1.000000e+00 : f32
    %34 = vector.broadcast %cst_12 : f32 to vector<8x128xf32>
    %35 = arith.addf %34, %33 : vector<8x128xf32>
    %36 = arith.divf %34, %35 : vector<8x128xf32>
    %37 = math.tanh %31 : vector<8x128xf32>
    %38 = vector.extract_strided_slice %36 {offsets = [0, 0], sizes = [8, 32], strides = [1, 1]} : vector<8x128xf32> to vector<8x32xf32>
    %39 = vector.extract_strided_slice %36 {offsets = [0, 32], sizes = [8, 32], strides = [1, 1]} : vector<8x128xf32> to vector<8x32xf32>
    %40 = vector.extract_strided_slice %37 {offsets = [0, 64], sizes = [8, 32], strides = [1, 1]} : vector<8x128xf32> to vector<8x32xf32>
    %41 = vector.extract_strided_slice %36 {offsets = [0, 96], sizes = [8, 32], strides = [1, 1]} : vector<8x128xf32> to vector<8x32xf32>
    %42 = arith.mulf %39, %25 : vector<8x32xf32>
    %43 = arith.mulf %38, %40 : vector<8x32xf32>
    %44 = arith.addf %42, %43 : vector<8x32xf32>
    %45 = math.tanh %44 : vector<8x32xf32>
    %46 = arith.mulf %41, %45 : vector<8x32xf32>
    %47 = vector.extract_strided_slice %5 {offsets = [16, 0], sizes = [8, 128], strides = [1, 1]} : vector<64x128xf32> to vector<8x128xf32>
    %48 = arith.truncf %46 : vector<8x32xf32> to vector<8x32xbf16>
    %cst_13 = arith.constant dense<0.000000e+00> : vector<8x128xf32>
    %49 = tpu.matmul %48, %6, %cst_13 {dimension_numbers = #tpu.dot_dimension_numbers<[1], [0], [0], [1], [0, 0, 1, 1], [], []>} : vector<8x32xbf16>, vector<32x128xbf16>, vector<8x128xf32> -> vector<8x128xf32>
    %50 = arith.addf %47, %49 : vector<8x128xf32>
    %51 = arith.negf %50 : vector<8x128xf32>
    %52 = math.exp %51 : vector<8x128xf32>
    %cst_14 = arith.constant 1.000000e+00 : f32
    %53 = vector.broadcast %cst_14 : f32 to vector<8x128xf32>
    %54 = arith.addf %53, %52 : vector<8x128xf32>
    %55 = arith.divf %53, %54 : vector<8x128xf32>
    %56 = math.tanh %50 : vector<8x128xf32>
    %57 = vector.extract_strided_slice %55 {offsets = [0, 0], sizes = [8, 32], strides = [1, 1]} : vector<8x128xf32> to vector<8x32xf32>
    %58 = vector.extract_strided_slice %55 {offsets = [0, 32], sizes = [8, 32], strides = [1, 1]} : vector<8x128xf32> to vector<8x32xf32>
    %59 = vector.extract_strided_slice %56 {offsets = [0, 64], sizes = [8, 32], strides = [1, 1]} : vector<8x128xf32> to vector<8x32xf32>
    %60 = vector.extract_strided_slice %55 {offsets = [0, 96], sizes = [8, 32], strides = [1, 1]} : vector<8x128xf32> to vector<8x32xf32>
    %61 = arith.mulf %58, %44 : vector<8x32xf32>
    %62 = arith.mulf %57, %59 : vector<8x32xf32>
    %63 = arith.addf %61, %62 : vector<8x32xf32>
    %64 = math.tanh %63 : vector<8x32xf32>
    %65 = arith.mulf %60, %64 : vector<8x32xf32>
    %66 = vector.extract_strided_slice %5 {offsets = [24, 0], sizes = [8, 128], strides = [1, 1]} : vector<64x128xf32> to vector<8x128xf32>
    %67 = arith.truncf %65 : vector<8x32xf32> to vector<8x32xbf16>
    %cst_15 = arith.constant dense<0.000000e+00> : vector<8x128xf32>
    %68 = tpu.matmul %67, %6, %cst_15 {dimension_numbers = #tpu.dot_dimension_numbers<[1], [0], [0], [1], [0, 0, 1, 1], [], []>} : vector<8x32xbf16>, vector<32x128xbf16>, vector<8x128xf32> -> vector<8x128xf32>
    %69 = arith.addf %66, %68 : vector<8x128xf32>
    %70 = arith.negf %69 : vector<8x128xf32>
    %71 = math.exp %70 : vector<8x128xf32>
    %cst_16 = arith.constant 1.000000e+00 : f32
    %72 = vector.broadcast %cst_16 : f32 to vector<8x128xf32>
    %73 = arith.addf %72, %71 : vector<8x128xf32>
    %74 = arith.divf %72, %73 : vector<8x128xf32>
    %75 = math.tanh %69 : vector<8x128xf32>
    %76 = vector.extract_strided_slice %74 {offsets = [0, 0], sizes = [8, 32], strides = [1, 1]} : vector<8x128xf32> to vector<8x32xf32>
    %77 = vector.extract_strided_slice %74 {offsets = [0, 32], sizes = [8, 32], strides = [1, 1]} : vector<8x128xf32> to vector<8x32xf32>
    %78 = vector.extract_strided_slice %75 {offsets = [0, 64], sizes = [8, 32], strides = [1, 1]} : vector<8x128xf32> to vector<8x32xf32>
    %79 = vector.extract_strided_slice %74 {offsets = [0, 96], sizes = [8, 32], strides = [1, 1]} : vector<8x128xf32> to vector<8x32xf32>
    %80 = arith.mulf %77, %63 : vector<8x32xf32>
    %81 = arith.mulf %76, %78 : vector<8x32xf32>
    %82 = arith.addf %80, %81 : vector<8x32xf32>
    %83 = math.tanh %82 : vector<8x32xf32>
    %84 = arith.mulf %79, %83 : vector<8x32xf32>
    %85 = vector.extract_strided_slice %5 {offsets = [32, 0], sizes = [8, 128], strides = [1, 1]} : vector<64x128xf32> to vector<8x128xf32>
    %86 = arith.truncf %84 : vector<8x32xf32> to vector<8x32xbf16>
    %cst_17 = arith.constant dense<0.000000e+00> : vector<8x128xf32>
    %87 = tpu.matmul %86, %6, %cst_17 {dimension_numbers = #tpu.dot_dimension_numbers<[1], [0], [0], [1], [0, 0, 1, 1], [], []>} : vector<8x32xbf16>, vector<32x128xbf16>, vector<8x128xf32> -> vector<8x128xf32>
    %88 = arith.addf %85, %87 : vector<8x128xf32>
    %89 = arith.negf %88 : vector<8x128xf32>
    %90 = math.exp %89 : vector<8x128xf32>
    %cst_18 = arith.constant 1.000000e+00 : f32
    %91 = vector.broadcast %cst_18 : f32 to vector<8x128xf32>
    %92 = arith.addf %91, %90 : vector<8x128xf32>
    %93 = arith.divf %91, %92 : vector<8x128xf32>
    %94 = math.tanh %88 : vector<8x128xf32>
    %95 = vector.extract_strided_slice %93 {offsets = [0, 0], sizes = [8, 32], strides = [1, 1]} : vector<8x128xf32> to vector<8x32xf32>
    %96 = vector.extract_strided_slice %93 {offsets = [0, 32], sizes = [8, 32], strides = [1, 1]} : vector<8x128xf32> to vector<8x32xf32>
    %97 = vector.extract_strided_slice %94 {offsets = [0, 64], sizes = [8, 32], strides = [1, 1]} : vector<8x128xf32> to vector<8x32xf32>
    %98 = vector.extract_strided_slice %93 {offsets = [0, 96], sizes = [8, 32], strides = [1, 1]} : vector<8x128xf32> to vector<8x32xf32>
    %99 = arith.mulf %96, %82 : vector<8x32xf32>
    %100 = arith.mulf %95, %97 : vector<8x32xf32>
    %101 = arith.addf %99, %100 : vector<8x32xf32>
    %102 = math.tanh %101 : vector<8x32xf32>
    %103 = arith.mulf %98, %102 : vector<8x32xf32>
    %104 = vector.extract_strided_slice %5 {offsets = [40, 0], sizes = [8, 128], strides = [1, 1]} : vector<64x128xf32> to vector<8x128xf32>
    %105 = arith.truncf %103 : vector<8x32xf32> to vector<8x32xbf16>
    %cst_19 = arith.constant dense<0.000000e+00> : vector<8x128xf32>
    %106 = tpu.matmul %105, %6, %cst_19 {dimension_numbers = #tpu.dot_dimension_numbers<[1], [0], [0], [1], [0, 0, 1, 1], [], []>} : vector<8x32xbf16>, vector<32x128xbf16>, vector<8x128xf32> -> vector<8x128xf32>
    %107 = arith.addf %104, %106 : vector<8x128xf32>
    %108 = arith.negf %107 : vector<8x128xf32>
    %109 = math.exp %108 : vector<8x128xf32>
    %cst_20 = arith.constant 1.000000e+00 : f32
    %110 = vector.broadcast %cst_20 : f32 to vector<8x128xf32>
    %111 = arith.addf %110, %109 : vector<8x128xf32>
    %112 = arith.divf %110, %111 : vector<8x128xf32>
    %113 = math.tanh %107 : vector<8x128xf32>
    %114 = vector.extract_strided_slice %112 {offsets = [0, 0], sizes = [8, 32], strides = [1, 1]} : vector<8x128xf32> to vector<8x32xf32>
    %115 = vector.extract_strided_slice %112 {offsets = [0, 32], sizes = [8, 32], strides = [1, 1]} : vector<8x128xf32> to vector<8x32xf32>
    %116 = vector.extract_strided_slice %113 {offsets = [0, 64], sizes = [8, 32], strides = [1, 1]} : vector<8x128xf32> to vector<8x32xf32>
    %117 = vector.extract_strided_slice %112 {offsets = [0, 96], sizes = [8, 32], strides = [1, 1]} : vector<8x128xf32> to vector<8x32xf32>
    %118 = arith.mulf %115, %101 : vector<8x32xf32>
    %119 = arith.mulf %114, %116 : vector<8x32xf32>
    %120 = arith.addf %118, %119 : vector<8x32xf32>
    %121 = math.tanh %120 : vector<8x32xf32>
    %122 = arith.mulf %117, %121 : vector<8x32xf32>
    %123 = vector.extract_strided_slice %5 {offsets = [48, 0], sizes = [8, 128], strides = [1, 1]} : vector<64x128xf32> to vector<8x128xf32>
    %124 = arith.truncf %122 : vector<8x32xf32> to vector<8x32xbf16>
    %cst_21 = arith.constant dense<0.000000e+00> : vector<8x128xf32>
    %125 = tpu.matmul %124, %6, %cst_21 {dimension_numbers = #tpu.dot_dimension_numbers<[1], [0], [0], [1], [0, 0, 1, 1], [], []>} : vector<8x32xbf16>, vector<32x128xbf16>, vector<8x128xf32> -> vector<8x128xf32>
    %126 = arith.addf %123, %125 : vector<8x128xf32>
    %127 = arith.negf %126 : vector<8x128xf32>
    %128 = math.exp %127 : vector<8x128xf32>
    %cst_22 = arith.constant 1.000000e+00 : f32
    %129 = vector.broadcast %cst_22 : f32 to vector<8x128xf32>
    %130 = arith.addf %129, %128 : vector<8x128xf32>
    %131 = arith.divf %129, %130 : vector<8x128xf32>
    %132 = math.tanh %126 : vector<8x128xf32>
    %133 = vector.extract_strided_slice %131 {offsets = [0, 0], sizes = [8, 32], strides = [1, 1]} : vector<8x128xf32> to vector<8x32xf32>
    %134 = vector.extract_strided_slice %131 {offsets = [0, 32], sizes = [8, 32], strides = [1, 1]} : vector<8x128xf32> to vector<8x32xf32>
    %135 = vector.extract_strided_slice %132 {offsets = [0, 64], sizes = [8, 32], strides = [1, 1]} : vector<8x128xf32> to vector<8x32xf32>
    %136 = vector.extract_strided_slice %131 {offsets = [0, 96], sizes = [8, 32], strides = [1, 1]} : vector<8x128xf32> to vector<8x32xf32>
    %137 = arith.mulf %134, %120 : vector<8x32xf32>
    %138 = arith.mulf %133, %135 : vector<8x32xf32>
    %139 = arith.addf %137, %138 : vector<8x32xf32>
    %140 = math.tanh %139 : vector<8x32xf32>
    %141 = arith.mulf %136, %140 : vector<8x32xf32>
    %142 = vector.extract_strided_slice %5 {offsets = [56, 0], sizes = [8, 128], strides = [1, 1]} : vector<64x128xf32> to vector<8x128xf32>
    %143 = arith.truncf %141 : vector<8x32xf32> to vector<8x32xbf16>
    %cst_23 = arith.constant dense<0.000000e+00> : vector<8x128xf32>
    %144 = tpu.matmul %143, %6, %cst_23 {dimension_numbers = #tpu.dot_dimension_numbers<[1], [0], [0], [1], [0, 0, 1, 1], [], []>} : vector<8x32xbf16>, vector<32x128xbf16>, vector<8x128xf32> -> vector<8x128xf32>
    %145 = arith.addf %142, %144 : vector<8x128xf32>
    %146 = arith.negf %145 : vector<8x128xf32>
    %147 = math.exp %146 : vector<8x128xf32>
    %cst_24 = arith.constant 1.000000e+00 : f32
    %148 = vector.broadcast %cst_24 : f32 to vector<8x128xf32>
    %149 = arith.addf %148, %147 : vector<8x128xf32>
    %150 = arith.divf %148, %149 : vector<8x128xf32>
    %151 = math.tanh %145 : vector<8x128xf32>
    %152 = vector.extract_strided_slice %150 {offsets = [0, 0], sizes = [8, 32], strides = [1, 1]} : vector<8x128xf32> to vector<8x32xf32>
    %153 = vector.extract_strided_slice %150 {offsets = [0, 32], sizes = [8, 32], strides = [1, 1]} : vector<8x128xf32> to vector<8x32xf32>
    %154 = vector.extract_strided_slice %151 {offsets = [0, 64], sizes = [8, 32], strides = [1, 1]} : vector<8x128xf32> to vector<8x32xf32>
    %155 = vector.extract_strided_slice %150 {offsets = [0, 96], sizes = [8, 32], strides = [1, 1]} : vector<8x128xf32> to vector<8x32xf32>
    %156 = arith.mulf %153, %139 : vector<8x32xf32>
    %157 = arith.mulf %152, %154 : vector<8x32xf32>
    %158 = arith.addf %156, %157 : vector<8x32xf32>
    %159 = math.tanh %158 : vector<8x32xf32>
    %160 = arith.mulf %155, %159 : vector<8x32xf32>
    %c0_25 = arith.constant 0 : index
    %c0_26 = arith.constant 0 : index
    %161 = vector.load %arg4[%c0_25, %c0_26] : memref<1x32xf32, #tpu.memory_space<vmem>>, vector<1x32xf32>
    %162 = vector.broadcast %161 : vector<1x32xf32> to vector<8x32xf32>
    %163 = arith.mulf %160, %162 : vector<8x32xf32>
    %cst_27 = arith.constant dense<0.000000e+00> : vector<8xf32>
    %164 = vector.multi_reduction <add>, %163, %cst_27 [1] : vector<8x32xf32> to vector<8xf32>
    %165 = vector.shape_cast %164 : vector<8xf32> to vector<8x1xf32>
    %c0_28 = arith.constant 0 : index
    %c0_29 = arith.constant 0 : index
    %166 = vector.load %arg5[%c0_28, %c0_29] : memref<1x1xf32, #tpu.memory_space<vmem>>, vector<1x1xf32>
    %167 = vector.broadcast %166 : vector<1x1xf32> to vector<8x1xf32>
    %168 = arith.addf %165, %167 : vector<8x1xf32>
    %169 = arith.negf %168 : vector<8x1xf32>
    %170 = math.exp %169 : vector<8x1xf32>
    %cst_30 = arith.constant 1.000000e+00 : f32
    %171 = vector.broadcast %cst_30 : f32 to vector<8x1xf32>
    %172 = arith.addf %171, %170 : vector<8x1xf32>
    %173 = arith.divf %171, %172 : vector<8x1xf32>
    %cst_31 = arith.constant 1.000000e+00 : f32
    %174 = vector.broadcast %cst_31 : f32 to vector<8x1xf32>
    %175 = arith.subf %174, %173 : vector<8x1xf32>
    %176 = tpu.concatenate %175, %173 in 1 : vector<8x1xf32>, vector<8x1xf32> -> vector<8x2xf32>
    %c0_32 = arith.constant 0 : index
    %c0_33 = arith.constant 0 : index
    %177 = vector.load %arg6[%c0_32, %c0_33] : memref<8x2xf32, #tpu.memory_space<vmem>>, vector<8x2xf32>
    tpu.vector_store %arg6[%c0_32, %c0_33], %176 {strides = array<i32>} : memref<8x2xf32, #tpu.memory_space<vmem>>, vector<8x2xf32>,
    return
  }
}

</mosaic_0001>

<bundles_post_ra>
// kernel: tpu_custom_call.1
= control target key start
LH: loop header
LB: loop body
LE: loop exit
PB: predicated region body
PF: predicated region fallthrough
CT: control target
= control target key end

     0   :  { %v995_v0 = vmov 0.0   ;;  %vm996_vm0 = vmmov 0   ;;  %vm69_vm1 = vcmask 130048   ;;  %v997_v6 = vmov 0   ;;  %s998_s7 = smov 64   ;;  %s1000_s13 = smov 96   ;;  %s1194_s1 = inlined_call_operand.vmem [shape: bf16[16,128], index: 1, kind: input, shape index: {}]   ;;  %s1195_s2 = inlined_call_operand.vmem [shape: bf16[32,128], index: 2, kind: input, shape index: {}]   ;;  %s1196_s0 = inlined_call_operand.vmem [shape: bf16[64,16], index: 0, kind: input, shape index: {}]   ;;  %s1197_s3 = inlined_call_operand.vmem [shape: f32[1,128], index: 3, kind: input, shape index: {}]   ;;  %s1198_s4 = inlined_call_operand.vmem [shape: f32[1,32], index: 4, kind: input, shape index: {}]   ;;  %s1199_s5 = inlined_call_operand.<no memory space> [shape: f32[1,1], index: 5, kind: input, shape index: {}]   ;;  %s1200_s6 = inlined_call_operand.vmem [shape: f32[8,2], index: 6, kind: output, shape index: {}]  }
   0x1   :  { %849 = vmatprep.subr.bf16.mxu1 %v995_v0  ;;  %v920_v1 = vld [vmem:[%s1194_s1] sm:$0xff]   ;;  %853 = vmatprep.mubr.msk.bf16.mxu1 %vm996_vm0, %v995_v0  ;;  %v1046_v2 = vld [vmem:[%s1195_s2 + $0x8] sm:$0xff]   ;;  %vm163_vm2 = vcmask 261120   ;;  %v925_v49 = vld [vmem:[%s1196_s0 + $0x10] sm:$0xff]   ;;  %vm772_vm3 = vcmask 7168   ;;  %vm774_vm4 = vcmask 15360  }
   0x2   :  { %839 = vmatprep.subr.bf16.mxu0 %v920_v1  ;;  %v922_v3 = vld [vmem:[%s1196_s0] sm:$0xff]   ;;  %850 = vmatpush3.bf16.msra.mxu1 %v1046_v2  ;;  %v923_v4 = vld [vmem:[%s1196_s0 + $0x8] sm:$0xff]   ;;  %v926_v50 = vld [vmem:[%s1196_s0 + $0x18] sm:$0xff]  }
   0x3   :  { %840 = vmatpush3.bf16.msra.mxu0 %v920_v1  ;;  %841 = vmatprep.mubr.msk.bf16.mxu0 %vm69_vm1, %v922_v3  ;;  %v1060_v5 = vld [vmem:[%s1195_s2] sm:$0xff]  }
   0x4   :  { %851 = vmatprep.subr.bf16.mxu1 %v995_v0  ;;  %865 = vmatprep.subr.bf16.mxu0 %v995_v0  ;;  %v1081_v8 = vld [vmem:[%s1197_s3] ss:$0 sm:$0xff]  ;;  %s999_s3 = smov 32  }
   0x6   :  { %842 = vmatmul.mubr.msk.bf16.vlgmr.msra.gmra.mxu0 %vm69_vm1, %v923_v4  ;;  %852 = vmatpush3.bf16.msra.mxu1 %v1060_v5 }
   0x7   :  { %866 = vmatpush3.bf16.msra.mxu0 %v1046_v2  ;;  %857 = vmatprep.subr.bf16.mxu1 %v995_v0 }
   0x8   :  { %867 = vmatprep.subr.bf16.mxu0 %v995_v0  ;;  %845 = vmatprep.mubr.msk.bf16.mxu0 %vm69_vm1, %v925_v49 }
   0x9   :  { %854 = vmatmul.mubr.bf16.vlgmr.msra.gmra.mxu1 %v997_v6 }
   0xa   :  { %858 = vmatpush3.bf16.msra.mxu1 %v1046_v2  ;;  %861 = vmatprep.mubr.msk.bf16.mxu1 %vm996_vm0, %v995_v0 }
   0xb   :  { %859 = vmatprep.subr.bf16.mxu1 %v995_v0  ;;  %868 = vmatpush3.bf16.msra.mxu0 %v1060_v5 }
   0xc   :  { %881 = vmatprep.subr.bf16.mxu0 %v995_v0 }
   0xe   :  { %860 = vmatpush3.bf16.msra.mxu1 %v1060_v5  ;;  %846 = vmatmul.mubr.msk.bf16.gmra.mxu0 %vm69_vm1, %v926_v50 }
   0xf   :  { %873 = vmatprep.subr.bf16.mxu1 %v995_v0  ;;  %869 = vmatprep.mubr.msk.bf16.mxu0 %vm996_vm0, %v995_v0 }
  0xc6   :  { %v1076_v7 = vpop.f32.mrf.mxu0 }
  0xc7   :  { %v125_v60 = vadd.f32 %v1076_v7, %v1081_v8 }
  0xc8   :  { %v116_v9 = vpop.f32.mrf.mxu0 }
  0xc9   :  { %v117_v10 = vadd.f32 %v1081_v8, %v116_v9  ;;  %v201_v11 = vpop.f32.mrf.mxu1 }
  0xca   :  { %v1095_v31 = vpop.f32.mrf.mxu0 }
  0xcb   :  { %v207_v12 = vadd.f32 %v201_v11, %v117_v10  ;;  %v855_v13 = vpop.f32.mrf.mxu1 }
  0xcc   :  { %v119_v32 = vpop.f32.mrf.mxu0 }
  0xcd   :  { %927 = vtanh.f32 %v207_v12  ;;  %v204_v14 = vpop.f32.mrf.mxu1  ;;  %v792_v17 = vmul.f32 -1.442695, %v207_v12  ;;  %v120_v33 = vadd.f32 %v1081_v8, %v119_v32 }
  0xce   :  { %v1119_v56 = vpop.f32.mrf.mxu0 }
  0xcf   :  { %v856_v15 = vpop.f32.mrf.mxu1  ;;  %929 = vpow2.f32 %v792_v17 }
  0xd0   :  { %v1121_v57 = vpop.f32.mrf.mxu0 }
  0xd2   :  { %v1123_v58 = vpop.f32.mrf.mxu0 }
  0xd4   :  { %v1125_v59 = vpop.f32.mrf.mxu0 }
  0xda   :  { %v928_v16 = vpop.eup %927 }
  0xdb   :  { %217 = vrot.lane.b32.xlu0 %v928_v16, %s998_s7 }
  0xdc   :  { %v930_v18 = vpop.eup %929 }
  0xdd   :  { %v211_v19 = vadd.f32 1.0, %v930_v18 }
  0xdf   :  { %931 = vrcp.f32 %v211_v19 }
  0xec   :  { %v932_v20 = vpop.eup %931 }
  0xed   :  { %v215_v23 = vmul.f32 0.0, %v932_v20 }
 0x14d   :  { %v218_v21 = vpop.permute.xlu0 %217 }
 0x14e   :  { %v220_v22 = vmul.f32 %v932_v20, %v218_v21  ;;  %v128_v21 = vadd.f32 %v1095_v31, %v1081_v8 }
 0x150   :  { %222 = vrot.lane.b32.xlu0 %v220_v22, %s999_s3 }
 0x1c2   :  { %v223_v24 = vpop.permute.xlu0 %222 }
 0x1c3   :  { %v225_v25 = vadd.f32 %v223_v24, %v215_v23 }
 0x1c5   :  { %933 = vtanh.f32 %v225_v25 }
 0x1d2   :  { %v934_v26 = vpop.eup %933 }
 0x1d3   :  { %228 = vrot.lane.b32.xlu1 %v934_v26, %s998_s7 }
 0x245   :  { %v229_v27 = vpop.permute.xlu1 %228 }
 0x246   :  { %v231_v28 = vmul.f32 %v932_v20, %v229_v27 }
 0x248   :  { %v232_v29 = vpack.c.bf16 %v231_v28, %v231_v28 }
 0x24a   :  { %234 = vrot.lane.b32.xlu1 %v232_v29, %s999_s3 }
 0x2bc   :  { %v235_v30 = vpop.permute.xlu1 %234 }
 0x2bd   :  { %862 = vmatmul.mubr.msk.bf16.vlgmr.msra.gmra.mxu1 %vm163_vm2, %v235_v30 }
 0x2be   :  { %874 = vmatpush3.bf16.msra.mxu1 %v1046_v2  ;;  %877 = vmatprep.mubr.msk.bf16.mxu1 %vm996_vm0, %v995_v0 }
 0x2bf   :  { %875 = vmatprep.subr.bf16.mxu1 %v995_v0 }
 0x2c2   :  { %876 = vmatpush3.bf16.msra.mxu1 %v1060_v5 }
 0x2c3   :  { %889 = vmatprep.subr.bf16.mxu1 %v995_v0 }
 0x37d   :  { %v273_v34 = vpop.f32.mrf.mxu1 }
 0x37e   :  { %v279_v35 = vadd.f32 %v273_v34, %v120_v33 }
 0x37f   :  { %v863_v36 = vpop.f32.mrf.mxu1 }
 0x380   :  { %935 = vtanh.f32 %v279_v35  ;;  %v794_v40 = vmul.f32 -1.442695, %v279_v35 }
 0x381   :  { %v276_v37 = vpop.f32.mrf.mxu1 }
 0x382   :  { %937 = vpow2.f32 %v794_v40 }
 0x383   :  { %v864_v38 = vpop.f32.mrf.mxu1 }
 0x38d   :  { %v936_v39 = vpop.eup %935 }
 0x38e   :  { %289 = vrot.lane.b32.xlu0 %v936_v39, %s998_s7 }
 0x38f   :  { %v938_v41 = vpop.eup %937 }
 0x390   :  { %v283_v42 = vadd.f32 1.0, %v938_v41 }
 0x392   :  { %939 = vrcp.f32 %v283_v42  ;;  %v133_v42 = vadd.f32 %v1081_v8, %v1121_v57 }
 0x39f   :  { %v940_v43 = vpop.eup %939 }
 0x3a0   :  { %v287_v46 = vmul.f32 %v940_v43, %v225_v25 }
 0x400   :  { %v290_v44 = vpop.permute.xlu0 %289 }
 0x401   :  { %v292_v45 = vmul.f32 %v940_v43, %v290_v44 }
 0x403   :  { %294 = vrot.lane.b32.xlu1 %v292_v45, %s999_s3 }
 0x475   :  { %v295_v47 = vpop.permute.xlu1 %294 }
 0x476   :  { %v297_v48 = vadd.f32 %v295_v47, %v287_v46 }
 0x478   :  { %941 = vtanh.f32 %v297_v48 }
 0x485   :  { %v942_v51 = vpop.eup %941 }
 0x486   :  { %300 = vrot.lane.b32.xlu0 %v942_v51, %s998_s7 }
 0x4f8   :  { %v301_v52 = vpop.permute.xlu0 %300 }
 0x4f9   :  { %v303_v53 = vmul.f32 %v940_v43, %v301_v52 }
 0x4fb   :  { %v304_v54 = vpack.c.bf16 %v303_v53, %v303_v53 }
 0x4fd   :  { %306 = vrot.lane.b32.xlu1 %v304_v54, %s999_s3 }
 0x56f   :  { %v307_v55 = vpop.permute.xlu1 %306 }
 0x570   :  { %870 = vmatmul.mubr.msk.bf16.vlgmr.msra.gmra.mxu0 %vm163_vm2, %v307_v55 }
 0x571   :  { %882 = vmatpush3.bf16.msra.mxu0 %v1046_v2  ;;  %885 = vmatprep.mubr.msk.bf16.mxu0 %vm996_vm0, %v995_v0 }
 0x572   :  { %883 = vmatprep.subr.bf16.mxu0 %v995_v0 }
 0x575   :  { %884 = vmatpush3.bf16.msra.mxu0 %v1060_v5 }
 0x576   :  { %897 = vmatprep.subr.bf16.mxu0 %v995_v0 }
 0x630   :  { %v345_v61 = vpop.f32.mrf.mxu0 }
 0x631   :  { %v351_v62 = vadd.f32 %v345_v61, %v125_v60 }
 0x632   :  { %v871_v63 = vpop.f32.mrf.mxu0 }
 0x633   :  { %943 = vtanh.f32 %v351_v62  ;;  %v796_v6 = vmul.f32 -1.442695, %v351_v62 }
 0x634   :  { %v348_v1 = vpop.f32.mrf.mxu0 }
 0x635   :  { %945 = vpow2.f32 %v796_v6 }
 0x636   :  { %v872_v3 = vpop.f32.mrf.mxu0 }
 0x640   :  { %v944_v4 = vpop.eup %943 }
 0x641   :  { %361 = vrot.lane.b32.xlu0 %v944_v4, %s998_s7  ;;  %v136_v4 = vadd.f32 %v1081_v8, %v1125_v59 }
 0x642   :  { %v946_v9 = vpop.eup %945 }
 0x643   :  { %v355_v10 = vadd.f32 1.0, %v946_v9 }
 0x645   :  { %947 = vrcp.f32 %v355_v10 }
 0x652   :  { %v948_v11 = vpop.eup %947 }
 0x653   :  { %v359_v7 = vmul.f32 %v948_v11, %v297_v48 }
 0x6b3   :  { %v362_v12 = vpop.permute.xlu0 %361 }
 0x6b4   :  { %v364_v13 = vmul.f32 %v948_v11, %v362_v12 }
 0x6b6   :  { %366 = vrot.lane.b32.xlu1 %v364_v13, %s999_s3 }
 0x728   :  { %v367_v14 = vpop.permute.xlu1 %366 }
 0x729   :  { %v369_v15 = vadd.f32 %v367_v14, %v359_v7 }
 0x72b   :  { %949 = vtanh.f32 %v369_v15 }
 0x738   :  { %v950_v16 = vpop.eup %949 }
 0x739   :  { %372 = vrot.lane.b32.xlu0 %v950_v16, %s998_s7 }
 0x7ab   :  { %v373_v17 = vpop.permute.xlu0 %372 }
 0x7ac   :  { %v375_v18 = vmul.f32 %v948_v11, %v373_v17 }
 0x7ae   :  { %v376_v19 = vpack.c.bf16 %v375_v18, %v375_v18 }
 0x7b0   :  { %378 = vrot.lane.b32.xlu1 %v376_v19, %s999_s3 }
 0x822   :  { %v379_v20 = vpop.permute.xlu1 %378 }
 0x823   :  { %878 = vmatmul.mubr.msk.bf16.vlgmr.msra.gmra.mxu1 %vm163_vm2, %v379_v20 }
 0x824   :  { %890 = vmatpush3.bf16.msra.mxu1 %v1046_v2  ;;  %893 = vmatprep.mubr.msk.bf16.mxu1 %vm996_vm0, %v995_v0 }
 0x825   :  { %891 = vmatprep.subr.bf16.mxu1 %v995_v0 }
 0x828   :  { %892 = vmatpush3.bf16.msra.mxu1 %v1060_v5 }
 0x829   :  { %905 = vmatprep.subr.bf16.mxu1 %v995_v0 }
 0x8e3   :  { %v417_v22 = vpop.f32.mrf.mxu1 }
 0x8e4   :  { %v423_v23 = vadd.f32 %v417_v22, %v128_v21 }
 0x8e5   :  { %v879_v24 = vpop.f32.mrf.mxu1 }
 0x8e6   :  { %951 = vtanh.f32 %v423_v23  ;;  %v798_v28 = vmul.f32 -1.442695, %v423_v23  ;;  %v141_v23 = vadd.f32 %v1119_v56, %v1081_v8 }
 0x8e7   :  { %v420_v25 = vpop.f32.mrf.mxu1 }
 0x8e8   :  { %953 = vpow2.f32 %v798_v28 }
 0x8e9   :  { %v880_v26 = vpop.f32.mrf.mxu1 }
 0x8f3   :  { %v952_v27 = vpop.eup %951 }
 0x8f4   :  { %433 = vrot.lane.b32.xlu0 %v952_v27, %s998_s7 }
 0x8f5   :  { %v954_v29 = vpop.eup %953 }
 0x8f6   :  { %v427_v30 = vadd.f32 1.0, %v954_v29 }
 0x8f8   :  { %955 = vrcp.f32 %v427_v30 }
 0x905   :  { %v956_v32 = vpop.eup %955 }
 0x906   :  { %v431_v31 = vmul.f32 %v956_v32, %v369_v15 }
 0x966   :  { %v434_v33 = vpop.permute.xlu0 %433 }
 0x967   :  { %v436_v34 = vmul.f32 %v956_v32, %v434_v33 }
 0x969   :  { %438 = vrot.lane.b32.xlu1 %v436_v34, %s999_s3 }
 0x9db   :  { %v439_v35 = vpop.permute.xlu1 %438 }
 0x9dc   :  { %v441_v36 = vadd.f32 %v439_v35, %v431_v31 }
 0x9de   :  { %957 = vtanh.f32 %v441_v36 }
 0x9eb   :  { %v958_v37 = vpop.eup %957 }
 0x9ec   :  { %444 = vrot.lane.b32.xlu0 %v958_v37, %s998_s7 }
 0xa5e   :  { %v445_v38 = vpop.permute.xlu0 %444 }
 0xa5f   :  { %v447_v39 = vmul.f32 %v956_v32, %v445_v38 }
 0xa61   :  { %v448_v40 = vpack.c.bf16 %v447_v39, %v447_v39 }
 0xa63   :  { %450 = vrot.lane.b32.xlu1 %v448_v40, %s999_s3 }
 0xad5   :  { %v451_v41 = vpop.permute.xlu1 %450 }
 0xad6   :  { %886 = vmatmul.mubr.msk.bf16.vlgmr.msra.gmra.mxu0 %vm163_vm2, %v451_v41 }
 0xad7   :  { %898 = vmatpush3.bf16.msra.mxu0 %v1046_v2  ;;  %901 = vmatprep.mubr.msk.bf16.mxu0 %vm996_vm0, %v995_v0 }
 0xad8   :  { %899 = vmatprep.subr.bf16.mxu0 %v995_v0 }
 0xadb   :  { %900 = vmatpush3.bf16.msra.mxu0 %v1060_v5 }
 0xb96   :  { %v489_v43 = vpop.f32.mrf.mxu0 }
 0xb97   :  { %v495_v44 = vadd.f32 %v489_v43, %v133_v42  ;;  %v144_v43 = vadd.f32 %v1123_v58, %v1081_v8  ;;  %v807_v8 = vld [vmem:[%s1198_s4] ss:$0 sm:$0xff]  ;;  %s1001_s4 = smov 1  }
 0xb98   :  { %v887_v45 = vpop.f32.mrf.mxu0 }
 0xb99   :  { %959 = vtanh.f32 %v495_v44  ;;  %v800_v49 = vmul.f32 -1.442695, %v495_v44 }
 0xb9a   :  { %v492_v46 = vpop.f32.mrf.mxu0 }
 0xb9b   :  { %961 = vpow2.f32 %v800_v49 }
 0xb9c   :  { %v888_v47 = vpop.f32.mrf.mxu0 }
 0xba6   :  { %v960_v48 = vpop.eup %959 }
 0xba7   :  { %505 = vrot.lane.b32.xlu0 %v960_v48, %s998_s7 }
 0xba8   :  { %v962_v50 = vpop.eup %961 }
 0xba9   :  { %v499_v51 = vadd.f32 1.0, %v962_v50 }
 0xbab   :  { %963 = vrcp.f32 %v499_v51 }
 0xbb8   :  { %v964_v52 = vpop.eup %963 }
 0xbb9   :  { %v503_v55 = vmul.f32 %v964_v52, %v441_v36 }
 0xc19   :  { %v506_v53 = vpop.permute.xlu0 %505 }
 0xc1a   :  { %v508_v54 = vmul.f32 %v964_v52, %v506_v53 }
 0xc1c   :  { %510 = vrot.lane.b32.xlu1 %v508_v54, %s999_s3 }
 0xc8e   :  { %v511_v57 = vpop.permute.xlu1 %510 }
 0xc8f   :  { %v513_v60 = vadd.f32 %v511_v57, %v503_v55 }
 0xc91   :  { %965 = vtanh.f32 %v513_v60 }
 0xc9e   :  { %v966_v61 = vpop.eup %965 }
 0xc9f   :  { %516 = vrot.lane.b32.xlu0 %v966_v61, %s998_s7 }
 0xd11   :  { %v517_v62 = vpop.permute.xlu0 %516 }
 0xd12   :  { %v519_v63 = vmul.f32 %v964_v52, %v517_v62  ;;  %v11_v62 = vstv %s1199_s5 }
 0xd13   :  { %12 = vst [vmem:[#allocation2] sm:$0x1] %v11_v62 }
 0xd14   :  { %v520_v1 = vpack.c.bf16 %v519_v63, %v519_v63 }
 0xd16   :  { %522 = vrot.lane.b32.xlu1 %v520_v1, %s999_s3 }
 0xd88   :  { %v523_v3 = vpop.permute.xlu1 %522 }
 0xd89   :  { %894 = vmatmul.mubr.msk.bf16.vlgmr.msra.gmra.mxu1 %vm163_vm2, %v523_v3 }
 0xd8a   :  { %906 = vmatpush3.bf16.msra.mxu1 %v1046_v2  ;;  %909 = vmatprep.mubr.msk.bf16.mxu1 %vm996_vm0, %v995_v0 }
 0xd8b   :  { %907 = vmatprep.subr.bf16.mxu1 %v995_v0 }
 0xd8e   :  { %908 = vmatpush3.bf16.msra.mxu1 %v1060_v5 }
 0xe49   :  { %v561_v6 = vpop.f32.mrf.mxu1 }
 0xe4a   :  { %v567_v9 = vadd.f32 %v561_v6, %v136_v4 }
 0xe4b   :  { %v895_v10 = vpop.f32.mrf.mxu1 }
 0xe4c   :  { %967 = vtanh.f32 %v567_v9  ;;  %v802_v2 = vmul.f32 -1.442695, %v567_v9  ;;  %v808_v10 = vld [vmem:[#allocation2] ss:$0 sm:$0xff] }
 0xe4d   :  { %v564_v11 = vpop.f32.mrf.mxu1 }
 0xe4e   :  { %969 = vpow2.f32 %v802_v2 }
 0xe4f   :  { %v896_v12 = vpop.f32.mrf.mxu1 }
 0xe59   :  { %v968_v13 = vpop.eup %967 }
 0xe5a   :  { %577 = vrot.lane.b32.xlu0 %v968_v13, %s998_s7 }
 0xe5b   :  { %v970_v7 = vpop.eup %969 }
 0xe5c   :  { %v571_v14 = vadd.f32 1.0, %v970_v7 }
 0xe5e   :  { %971 = vrcp.f32 %v571_v14 }
 0xe6b   :  { %v972_v0 = vpop.eup %971 }
 0xe6c   :  { %v575_v59 = vmul.f32 %v972_v0, %v513_v60 }
 0xecc   :  { %v578_v15 = vpop.permute.xlu0 %577 }
 0xecd   :  { %v580_v5 = vmul.f32 %v972_v0, %v578_v15 }
 0xecf   :  { %582 = vrot.lane.b32.xlu1 %v580_v5, %s999_s3 }
 0xf41   :  { %v583_v16 = vpop.permute.xlu1 %582 }
 0xf42   :  { %v585_v17 = vadd.f32 %v583_v16, %v575_v59 }
 0xf44   :  { %973 = vtanh.f32 %v585_v17 }
 0xf51   :  { %v974_v18 = vpop.eup %973 }
 0xf52   :  { %588 = vrot.lane.b32.xlu0 %v974_v18, %s998_s7 }
 0xfc4   :  { %v589_v19 = vpop.permute.xlu0 %588 }
 0xfc5   :  { %v591_v20 = vmul.f32 %v972_v0, %v589_v19 }
 0xfc7   :  { %v592_v21 = vpack.c.bf16 %v591_v20, %v591_v20 }
 0xfc9   :  { %594 = vrot.lane.b32.xlu1 %v592_v21, %s999_s3 }
0x103b   :  { %v595_v22 = vpop.permute.xlu1 %594 }
0x103c   :  { %902 = vmatmul.mubr.msk.bf16.vlgmr.msra.gmra.mxu0 %vm163_vm2, %v595_v22 }
0x10fc   :  { %v633_v24 = vpop.f32.mrf.mxu0 }
0x10fd   :  { %v639_v25 = vadd.f32 %v633_v24, %v141_v23 }
0x10fe   :  { %v903_v26 = vpop.f32.mrf.mxu0 }
0x10ff   :  { %975 = vtanh.f32 %v639_v25  ;;  %v804_v30 = vmul.f32 -1.442695, %v639_v25 }
0x1100   :  { %v636_v27 = vpop.f32.mrf.mxu0 }
0x1101   :  { %977 = vpow2.f32 %v804_v30 }
0x1102   :  { %v904_v28 = vpop.f32.mrf.mxu0 }
0x110c   :  { %v976_v29 = vpop.eup %975 }
0x110d   :  { %649 = vrot.lane.b32.xlu0 %v976_v29, %s998_s7 }
0x110e   :  { %v978_v32 = vpop.eup %977 }
0x110f   :  { %v643_v33 = vadd.f32 1.0, %v978_v32 }
0x1111   :  { %979 = vrcp.f32 %v643_v33 }
0x111e   :  { %v980_v34 = vpop.eup %979 }
0x111f   :  { %v647_v56 = vmul.f32 %v980_v34, %v585_v17 }
0x117f   :  { %v650_v31 = vpop.permute.xlu0 %649 }
0x1180   :  { %v652_v35 = vmul.f32 %v980_v34, %v650_v31 }
0x1182   :  { %654 = vrot.lane.b32.xlu1 %v652_v35, %s999_s3 }
0x11f4   :  { %v655_v36 = vpop.permute.xlu1 %654 }
0x11f5   :  { %v657_v37 = vadd.f32 %v655_v36, %v647_v56 }
0x11f7   :  { %981 = vtanh.f32 %v657_v37 }
0x1204   :  { %v982_v38 = vpop.eup %981 }
0x1205   :  { %660 = vrot.lane.b32.xlu0 %v982_v38, %s998_s7 }
0x1277   :  { %v661_v39 = vpop.permute.xlu0 %660 }
0x1278   :  { %v663_v40 = vmul.f32 %v980_v34, %v661_v39 }
0x127a   :  { %v664_v41 = vpack.c.bf16 %v663_v40, %v663_v40 }
0x127c   :  { %666 = vrot.lane.b32.xlu1 %v664_v41, %s999_s3 }
0x12ee   :  { %v667_v42 = vpop.permute.xlu1 %666 }
0x12ef   :  { %910 = vmatmul.mubr.msk.bf16.vlgmr.msra.gmra.mxu1 %vm163_vm2, %v667_v42 }
0x13af   :  { %v705_v44 = vpop.f32.mrf.mxu1 }
0x13b0   :  { %v711_v45 = vadd.f32 %v705_v44, %v144_v43 }
0x13b1   :  { %v911_v46 = vpop.f32.mrf.mxu1 }
0x13b2   :  { %983 = vtanh.f32 %v711_v45  ;;  %v806_v50 = vmul.f32 -1.442695, %v711_v45 }
0x13b3   :  { %v708_v47 = vpop.f32.mrf.mxu1 }
0x13b4   :  { %985 = vpow2.f32 %v806_v50 }
0x13b5   :  { %v912_v48 = vpop.f32.mrf.mxu1 }
0x13bf   :  { %v984_v49 = vpop.eup %983 }
0x13c0   :  { %721 = vrot.lane.b32.xlu0 %v984_v49, %s998_s7 }
0x13c1   :  { %v986_v51 = vpop.eup %985 }
0x13c2   :  { %v715_v52 = vadd.f32 1.0, %v986_v51 }
0x13c4   :  { %987 = vrcp.f32 %v715_v52 }
0x13d1   :  { %v988_v53 = vpop.eup %987 }
0x13d2   :  { %v719_v58 = vmul.f32 %v988_v53, %v657_v37 }
0x1432   :  { %v722_v54 = vpop.permute.xlu0 %721 }
0x1433   :  { %v724_v55 = vmul.f32 %v988_v53, %v722_v54 }
0x1435   :  { %726 = vrot.lane.b32.xlu1 %v724_v55, %s999_s3 }
0x1439   :  { %742 = vrot.lane.b32.xlu1 %v807_v8, %s1000_s13 }
0x14a7   :  { %v727_v57 = vpop.permute.xlu1 %726 }
0x14a8   :  { %v729_v60 = vadd.f32 %v727_v57, %v719_v58 }
0x14aa   :  { %989 = vtanh.f32 %v729_v60 }
0x14ab   :  { %v743_v1 = vpop.permute.xlu1 %742 }
0x14b7   :  { %v990_v61 = vpop.eup %989 }
0x14b8   :  { %732 = vrot.lane.b32.xlu0 %v990_v61, %s998_s7 }
0x152a   :  { %v733_v63 = vpop.permute.xlu0 %732 }
0x152b   :  { %v735_v3 = vmul.f32 %v988_v53, %v733_v63 }
0x152d   :  { %v745_v4 = vmul.f32 %v743_v1, %v735_v3 }
0x152f   :  { %747 = vrot.lane.b32.xlu0 %v745_v4, %s999_s3 }
0x15a1   :  { %v748_v6 = vpop.permute.xlu0 %747 }
0x15a2   :  { %v750_v9 = vsel %vm163_vm2, %v748_v6, 0.0 }
0x15a3   :  { %751 = vadd.xlane.f32.xlu1 %v750_v9 }
0x162c   :  { %v752_v11 = vpop.xlane.xlu1 %751 }
0x162d   :  { %v760_v12 = vadd.f32 %v808_v10, %v752_v11 }
0x162f   :  { %v809_v13 = vmul.f32 -1.442695, %v760_v12 }
0x1631   :  { %991 = vpow2.f32 %v809_v13 }
0x163e   :  { %v992_v2 = vpop.eup %991 }
0x163f   :  { %v764_v7 = vadd.f32 1.0, %v992_v2 }
0x1641   :  { %993 = vrcp.f32 %v764_v7 }
0x164e   :  { %v994_v14 = vpop.eup %993 }
0x164f   :  { %769 = vrot.lane.b32.xlu0 %v994_v14, %s1001_s4  ;;  %v767_v0 = vsub.f32 1.0, %v994_v14 }
0x16c1   :  { %v770_v15 = vpop.permute.xlu0 %769 }
0x16c2   :  { %v773_v5 = vsel %vm772_vm3, %v767_v0, %v770_v15 }
0x16c3   :  { %775 = vst.msk [vmem:[%s1200_s6] sm:$0xff] %vm774_vm4, %v773_v5 }

</bundles_post_ra>
